<compile_context>
chip_gen: v7x
topology: tpu7x:2x2x1
jax: 0.10.0
libtpu: 0.0.40
codegen_flags: <defaults>
</compile_context>

<pallas_src>
import math

import numpy as np
import jax
import jax.numpy as jnp
from jax.experimental import pallas as pl
from jax.experimental.pallas import tpu as pltpu


_LANES = 512  # lane extent of the output slab: multiple of 128 => unmasked full-vreg stores


def _round_up(x: int, m: int) -> int:
    return ((x + m - 1) // m) * m


def _default_block_bytes() -> int:
    """Generation-dependent output-block byte budget (writeback-DMA amortization)."""
    try:
        kind = jax.devices()[0].device_kind.lower()
    except Exception:
        kind = ""
    if "v7" in kind:
        # v7x: 3.2 TB/s HBM makes the ~0.35us/step overhead dominant at small
        # blocks; 8 MiB blocks (16 MiB double-buffered) fit its 64 MiB VMEM.
        return 8 << 20
    # v5e / v6e: 4 MiB already amortizes step overhead to ~90%+ of roofline and
    # the 8 MiB double-buffer fits even v5e's scoped-VMEM comfortably.
    return 4 << 20


def _fill_kernel(skill_ref, o_ref):
    """skill_ref: (1,) float32 in SMEM. Cast the SCALAR once, then splat the tile.

    The VPU splat + vector stores are fully hidden behind the output writeback
    DMA; the kernel is writeback-bound by construction.
    """
    val = skill_ref[0].astype(o_ref.dtype)
    o_ref[...] = jnp.full(o_ref.shape, val, dtype=o_ref.dtype)


def mock_network_forward(seats: jax.Array, skill, *,
                         min_pallas_elems: int = 64 * 1024,
                         block_bytes: int | None = None) -> jax.Array:
    """Pallas equivalent of MockNetwork.forward: full_like(seats, float32(skill))."""
    out_dtype = seats.dtype
    n = int(math.prod(seats.shape)) if seats.ndim else 1

    # torch: register_buffer('skill', torch.as_tensor(skill).float())
    skill_f32 = jnp.asarray(skill, dtype=jnp.float32)
    if skill_f32.ndim != 0:
        assert skill_f32.size == 1, "MockNetwork.skill must be a scalar"
        skill_f32 = skill_f32.reshape(())
    # NOTE: float->int cast truncates toward zero (matches torch for ordinary
    # finite values; NaN/inf would diverge — irrelevant for MockNetwork).

    # Fallback: tiny or lane-unaligned outputs. jnp.full is already at the HBM
    # write roofline with NO epilogue; a Pallas path for unaligned n would need
    # a reshape+slice copy that roughly triples effective HBM traffic.
    if n == 0 or n % _LANES != 0 or n < max(min_pallas_elems, _LANES):
        return jnp.full(seats.shape, skill_f32.astype(out_dtype), dtype=out_dtype)

    itemsize = jnp.dtype(out_dtype).itemsize
    sublane = max(8, 32 // itemsize)      # 8 for 4-byte, 16 for 2-byte, 32 for 1-byte dtypes
    rows = n // _LANES                    # exact: n is lane-aligned

    if block_bytes is None:
        block_bytes = _default_block_bytes()
    bytes_per_row = _LANES * itemsize
    block_rows = max(sublane, (block_bytes // bytes_per_row) // sublane * sublane)
    block_rows = min(block_rows, _round_up(rows, sublane))   # never bigger than needed
    # Prefer >=2 grid steps (when there is enough work) so the "parallel" axis
    # can shard the memset across v7x's 2 TensorCores.
    if pl.cdiv(rows, block_rows) < 2 and rows > sublane:
        block_rows = _round_up(pl.cdiv(rows, 2), sublane)
    grid = (pl.cdiv(rows, block_rows),)   # partial last block is handled by Pallas

    out_2d = pl.pallas_call(
        _fill_kernel,
        grid=grid,
        in_specs=[pl.BlockSpec(memory_space=pltpu.SMEM)],     # skill scalar lives in SMEM
        out_specs=pl.BlockSpec((block_rows, _LANES), lambda i: (i, 0)),
        out_shape=jax.ShapeDtypeStruct((rows, _LANES), out_dtype),
        compiler_params=pltpu.CompilerParams(
            dimension_semantics=("parallel",),
            vmem_limit_bytes=32 * 1024 * 1024,                # 2x block double-buffer fits easily
        ),
        cost_estimate=pl.CostEstimate(
            flops=0, transcendentals=0,
            bytes_accessed=rows * _LANES * itemsize),
    )(skill_f32.reshape(1))

    # n is lane-aligned and out_2d holds exactly n elements, so this reshape is
    # a pure metadata change (bitcast) — no epilogue copy.
    return out_2d.reshape(seats.shape)


if __name__ == "__main__":
    key = jax.random.PRNGKey(0)

    # "worlds.seats": 1-D (n_envs,) vector of integer seat ids. Lane-aligned
    # size so the Pallas path (not the jnp.full fallback) is exercised.
    n_envs = 4096  # = 8 sublane rows x 512 lanes for int32
    seats = jax.random.randint(key, (n_envs,), minval=0, maxval=2, dtype=jnp.int32)

    # The module's only state is a scalar skill buffer (float32).
    skill = 7.0

    out = mock_network_forward(seats, skill, min_pallas_elems=0)
    out = jax.block_until_ready(out)
    ref = jnp.full_like(seats, jnp.asarray(skill, jnp.float32).astype(seats.dtype))
    assert out.shape == seats.shape, (out.shape, seats.shape)
    assert out.dtype == seats.dtype, (out.dtype, seats.dtype)
    assert bool(jnp.all(out == ref)), (out, ref)

    # Float32 seats, traced skill, still on the Pallas path.
    seats_f = jax.random.normal(jax.random.PRNGKey(0), (n_envs,), dtype=jnp.float32)
    skill_arr = jnp.float32(2.5)
    out_f = jax.block_until_ready(
        mock_network_forward(seats_f, skill_arr, min_pallas_elems=0))
    ref_f = jnp.full_like(seats_f, skill_arr)
    assert out_f.shape == seats_f.shape and out_f.dtype == seats_f.dtype
    assert bool(jnp.all(out_f == ref_f)), (out_f, ref_f)

    # Lane-unaligned size: takes the epilogue-free jnp.full fallback path.
    n2 = 300
    seats2 = jax.random.randint(jax.random.PRNGKey(1), (n2,), 0, 3, dtype=jnp.int32)
    out2 = jax.block_until_ready(mock_network_forward(seats2, jnp.float32(3.0)))
    ref2 = jnp.full_like(seats2, jnp.float32(3.0).astype(seats2.dtype))
    assert out2.shape == seats2.shape and out2.dtype == seats2.dtype
    assert bool(jnp.all(out2 == ref2)), (out2, ref2)

    print("KERNEL_OK")
</pallas_src>

<mosaic_0001>
module attributes {stable_mosaic.version = 11 : i64} {
  func.func @_fill_kernel(%arg0: i32, %arg1: memref<1xf32, #tpu.memory_space<smem>>, %arg2: memref<8x512xi32, #tpu.memory_space<vmem>>) attributes {dimension_semantics = [#tpu.dimension_semantics<parallel>], iteration_bounds = array<i64: 1>, scalar_prefetch = 0 : i64, scratch_operands = 0 : i64, tpu.core_type = #tpu.core_type<tc>, window_params = [{transform_indices = @transform_0, window_bounds = array<i64: 1>}, {transform_indices = @transform_1, window_bounds = array<i64: 8, 512>}]} {
    %c0 = arith.constant 0 : index
    %0 = memref.load %arg1[%c0] : memref<1xf32, #tpu.memory_space<smem>>
    %1 = arith.fptosi %0 : f32 to i32
    %2 = vector.broadcast %1 : i32 to vector<8x512xi32>
    %c0_0 = arith.constant 0 : index
    %c0_1 = arith.constant 0 : index
    %3 = vector.load %arg2[%c0_0, %c0_1] : memref<8x512xi32, #tpu.memory_space<vmem>>, vector<8x512xi32>
    tpu.vector_store %arg2[%c0_0, %c0_1], %2 {strides = array<i32>} : memref<8x512xi32, #tpu.memory_space<vmem>>, vector<8x512xi32>,
    return
  }
  func.func @transform_0(%arg0: i32) -> i32 {
    %c0_i32 = arith.constant 0 : i32
    %c0_i32_0 = arith.constant 0 : i32
    return %c0_i32 : i32
  }
  func.func @transform_1(%arg0: i32) -> (i32, i32) {
    %c0_i32 = arith.constant 0 : i32
    %c0_i32_0 = arith.constant 0 : i32
    return %arg0, %c0_i32 : i32, i32
  }
}

</mosaic_0001>

<bundles_post_ra>
// kernel: tpu_custom_call.1
= control target key start
LH: loop header
LB: loop body
LE: loop exit
PB: predicated region body
PF: predicated region fallthrough
CT: control target
= control target key end

     0   :  { %s93_s0 = inlined_call_operand.<no memory space> [shape: f32[1], index: 0, kind: input, shape index: {}]   ;;  %s94_s1 = inlined_call_operand.hbm [shape: s32[8,512], index: 1, kind: output, shape index: {}]  }
   0x1   :  { %p31_p0 = scmp.lt.s32.totalorder %s93_s0, 0  ;;  %s32_s10 = sceil.f32 %s93_s0 }
   0x2   :  { %7 = vsyncpa [#allocation4], 0  ;;  %s33_s13 = sfloor.f32 %s93_s0  ;;  %s61_s14 = smov [#allocation3]  }
   0x3   :  { %s96_s10 = smov (!%p31_p0, %s32_s10), %s33_s13  ;;  %s23_s15 = sshll.u32 %s61_s14, 4  ;;  %s24_s15 = int_to_ptr.vmem [resolvable:$true] %s23_s15 }
   0x4   :  { %s35_s16 = scvt.f32.s32 %s96_s10  ;;  %s37_s17 = scalar_lea.vmem %s24_s15, 512 }
   0x5   :  { %p38_p1 = scmp.ne.s32.totalorder %s24_s15, %s37_s17  ;;  %p42_p2 = scmp.lt.s32.totalorder %s24_s15, %s24_s15 }
   0x6   :  { %v12_v0 = vstv %s35_s16  ;;  %p43_p3 = scmp.lt.s32.totalorder %s37_s17, %s37_s17 }
   0x7   :  { %13 = vst [vmem:[#allocation3] sm:$0xff] %v12_v0  ;;  %14 = vst [vmem:[#allocation3 + $0x8] sm:$0xff] %v12_v0 }
   0x8   :  { %15 = vst [vmem:[#allocation3 + $0x10] sm:$0xff] %v12_v0  ;;  %16 = vst [vmem:[#allocation3 + $0x18] sm:$0xff] %v12_v0  ;;  %p44_p4 = por %p43_p3, %p42_p2 }
   0xa   :  { %p45_p5 = pnand %p44_p4, %p38_p1 }
   0xc   :  { %48 = shalt.err (!%p45_p5)
}
   0xd   :  { %s49_s0 = scalar_lea.hbm %s94_s1, 512 }
   0xe   :  { %p50_p6 = scmp.ne.s32.totalorder %s94_s1, %s49_s0  ;;  %p53_p7 = scmp.lt.u32.totalorder %s49_s0, %s94_s1 }
  0x10   :  { %p55_p8 = pnand %p53_p7, %p50_p6 }
  0x12   :  { %58 = shalt.err (!%p55_p8)
}
  0x13   :  { %26 = dma.vmem_to_hbm [thread:$0]  %s24_s15, 512, %s94_s1, [#allocation4]  }
  0x14   :  { %59 = dma.done.wait [#allocation4], 512  }
  0x15   :  { %60 = vsyncadd [#allocation4], 4294966784 }
  0x16   :  { %30 = vsyncpa [#allocation4], 1 }

</bundles_post_ra>
